<compile_context>
chip_gen: v6e
topology: v6e:2x2x1
jax: 0.10.0
libtpu: 0.0.40
codegen_flags: <defaults>
</compile_context>

<pallas_src>
import math

import jax
import jax.numpy as jnp
from jax import lax
from jax.experimental import pallas as pl
from jax.experimental.pallas import tpu as pltpu

K = 5          # conv kernel size
S = 3          # conv stride
KK = K * K     # 25 conv taps
KKP = KK + 1   # +1 "ones" tap carrying the conv bias


def _round_up(x, m):
    return ((x + m - 1) // m) * m


def _make_kernel(tt, fp, odim):
    def kernel(p_ref, w1_ref, w2_ref, pb_ref, o_ref):
        # p_ref : (Fp*tt, KKP)      bf16  f-major im2col patches (row = f*tt + t),
        #                                 last column = 1.0 (conv-bias tap)
        # w1_ref: (KKP, odim)       bf16  dense conv weight, bias row appended
        # w2_ref: (Fp, odim, odim)  bf16  per-freq linear weight * sqrt(odim)
        # pb_ref: (tt, odim)        f32   pos-enc tile + scaled linear bias
        # o_ref : (tt, odim)        f32
        h = jnp.dot(p_ref[...], w1_ref[...],
                    preferred_element_type=jnp.float32)            # (Fp*tt, odim)
        h = jnp.maximum(h, 0.0).astype(jnp.bfloat16)               # ReLU, cast once
        acc = pb_ref[...]                                          # PE + scaled bias
        # No relayout: contiguous sublane slices of h, one dot per frequency.
        for f in range(fp):                                        # static unroll
            acc = acc + jnp.dot(h[f * tt:(f + 1) * tt, :], w2_ref[f],
                                preferred_element_type=jnp.float32)
        # Output kept f32 to match the PyTorch module; flip to bf16 here if the
        # downstream consumer accepts it (halves the only large HBM write).
        o_ref[...] = acc
    return kernel


def sinusoidal_pe(max_len, d):
    pos = jnp.arange(max_len, dtype=jnp.float32)[:, None]
    div = jnp.exp(jnp.arange(0, d, 2, dtype=jnp.float32) * (-math.log(10000.0) / d))
    pe = jnp.zeros((max_len, d), jnp.float32)
    pe = pe.at[:, 0::2].set(jnp.sin(pos * div))
    pe = pe.at[:, 1::2].set(jnp.cos(pos * div))
    return pe


def conv2d_subsampling3(x, x_mask, conv_w, conv_b, lin_w, lin_b, pe,
                        offset=0, tt=128):
    """x: (B, T, idim) f32; x_mask: (B, 1, T) bool.
    Returns (y, pos_emb, mask_sub) matching the PyTorch module in eval mode."""
    B, T, idim = x.shape
    odim = conv_w.shape[0]
    assert T >= K and idim >= K, "input too short for the 5x5 / stride-3 conv"
    Tp = (T - K) // S + 1
    Fp = (idim - K) // S + 1
    assert Fp == (idim - 2) // 3 and Tp == (T - 2) // 3
    assert offset + Tp <= pe.shape[0], "positional-encoding table too short"

    # ---- choose the time tile: large enough to amortize per-step overhead and
    #      feed the MXU; when B == 1 cap it so nT >= 2 (v7x two-core sharding) ----
    tt = min(tt, _round_up(Tp, 8))
    if B == 1 and Tp > 8:
        tt = min(tt, _round_up((Tp + 1) // 2, 8))
    tt = max(tt, 8)
    Tp_pad = _round_up(Tp, tt)
    nT = Tp_pad // tt

    # ---- pad time so every tile's receptive field is in-bounds ----
    T_need = S * Tp_pad + (K - S)
    x_pad = jnp.pad(x, ((0, 0), (0, T_need - T), (0, 0))) if T_need > T else x

    # ---- glue: im2col gather, f-major inside each time tile, bf16, +ones col ----
    # TODO(synk): move this gather into the kernel (halo-slab DMA) — next lever.
    t_idx = S * jnp.arange(Tp_pad)[:, None] + jnp.arange(K)[None, :]    # (Tp_pad, K)
    f_idx = S * jnp.arange(Fp)[:, None] + jnp.arange(K)[None, :]        # (Fp, K)
    xt = x_pad[:, t_idx, :]                                             # (B, Tp_pad, K, idim)
    xp = xt[:, :, :, f_idx]                                             # (B, Tp_pad, K, Fp, K)
    xp = xp.reshape(B, nT, tt, K, Fp, K)
    patches = jnp.transpose(xp, (0, 1, 4, 2, 3, 5)).reshape(B, nT, Fp * tt, KK)
    ones = jnp.ones((B, nT, Fp * tt, 1), patches.dtype)
    patches = jnp.concatenate([patches, ones], axis=-1).astype(jnp.bfloat16)

    # ---- glue: pack parameters (constant-folds under jit / cacheable) ----
    xscale = math.sqrt(float(odim))
    w1 = jnp.concatenate([conv_w.reshape(odim, KK).T,
                          conv_b.reshape(1, odim)], axis=0).astype(jnp.bfloat16)  # (KKP, odim)
    # PyTorch linear in-feature index is c*Fp + f; kernel contracts per-f over c.
    w2 = jnp.transpose(lin_w.reshape(odim, odim, Fp), (2, 1, 0))         # (Fp, c, o)
    w2 = (w2 * xscale).astype(jnp.bfloat16)
    pe_slice = pe[offset:offset + Tp]                                    # (Tp, odim)
    pb = (jnp.pad(pe_slice, ((0, Tp_pad - Tp), (0, 0)))
          + (lin_b * xscale)[None, :]).astype(jnp.float32)               # (Tp_pad, odim)

    # ---- VMEM budget: raise the scoped limit only when needed (v5e @ large odim);
    #      stay under v7x's 64 MiB physical VMEM. ----
    step_bytes = (2 * Fp * tt * KKP * 2        # patches (double-buffered, bf16)
                  + 2 * KKP * odim * 2         # w1
                  + 2 * Fp * odim * odim * 2   # w2
                  + 2 * tt * odim * 4          # pe+bias
                  + 2 * tt * odim * 4          # out
                  + Fp * tt * odim * 6)        # h intermediates (f32 + bf16)
    vmem_limit = None
    if step_bytes > 12 * (1 << 20):
        vmem_limit = min(64 * (1 << 20), 2 * step_bytes)

    y = pl.pallas_call(
        _make_kernel(tt, Fp, odim),
        out_shape=jax.ShapeDtypeStruct((B, Tp_pad, odim), jnp.float32),
        grid=(B, nT),
        in_specs=[
            pl.BlockSpec((None, None, Fp * tt, KKP), lambda b, t: (b, t, 0, 0)),
            pl.BlockSpec((KKP, odim), lambda b, t: (0, 0)),
            pl.BlockSpec((Fp, odim, odim), lambda b, t: (0, 0, 0)),
            pl.BlockSpec((tt, odim), lambda b, t: (t, 0)),
        ],
        out_specs=pl.BlockSpec((None, tt, odim), lambda b, t: (b, t, 0)),
        compiler_params=pltpu.CompilerParams(
            dimension_semantics=("parallel", "parallel"),
            vmem_limit_bytes=vmem_limit),
    )(patches, w1, w2, pb)

    y = y[:, :Tp, :]                                                    # drop time pad
    pos_emb = pe_slice[None, :, :]                                      # (1, Tp, odim)
    mask_sub = x_mask[:, :, :-4:3]                                      # (B, 1, Tp)
    return y, pos_emb, mask_sub


def reference_forward(x, x_mask, conv_w, conv_b, lin_w, lin_b, pe, offset=0):
    """Plain-JAX f32 reference mirroring the PyTorch forward exactly (eval mode)."""
    B, T, idim = x.shape
    odim = conv_w.shape[0]
    xi = x[:, None, :, :]                                               # NCHW
    conv = lax.conv_general_dilated(xi, conv_w, window_strides=(S, S),
                                    padding="VALID",
                                    dimension_numbers=("NCHW", "OIHW", "NCHW"))
    conv = jnp.maximum(conv + conv_b[None, :, None, None], 0.0)
    _, C, Tp, Fp = conv.shape
    h = jnp.transpose(conv, (0, 2, 1, 3)).reshape(B, Tp, C * Fp)        # view(b, t, c*f)
    y = h @ lin_w.T + lin_b
    pe_s = lax.dynamic_slice_in_dim(pe, offset, Tp, axis=0)
    y = y * math.sqrt(float(odim)) + pe_s[None]
    return y, pe_s[None], x_mask[:, :, :-4:3]


if __name__ == "__main__":
    B, T, idim, odim = 2, 50, 26, 128
    Fp = (idim - 2) // 3                                                # 8
    Tp = (T - 2) // 3                                                   # 16

    key = jax.random.PRNGKey(0)
    k1, k2, k3, k4, k5 = jax.random.split(key, 5)
    x = jax.random.normal(k1, (B, T, idim), jnp.float32)
    x_mask = jnp.ones((B, 1, T), dtype=bool)

    # deterministic synthetic parameters (shapes from the module __init__)
    conv_w = jax.random.normal(k2, (odim, 1, K, K), jnp.float32) / math.sqrt(K * K)
    conv_b = 0.01 * jax.random.normal(k3, (odim,), jnp.float32)
    lin_w = jax.random.normal(k4, (odim, odim * Fp), jnp.float32) / math.sqrt(odim * Fp)
    lin_b = 0.01 * jax.random.normal(k5, (odim,), jnp.float32)
    pe = sinusoidal_pe(512, odim)

    y, pos_emb, mask_sub = conv2d_subsampling3(
        x, x_mask, conv_w, conv_b, lin_w, lin_b, pe, offset=0, tt=128)
    jax.block_until_ready(y)

    y_ref, pos_ref, mask_ref = reference_forward(
        x, x_mask, conv_w, conv_b, lin_w, lin_b, pe, offset=0)

    assert y.shape == (B, Tp, odim)
    assert pos_emb.shape == (1, Tp, odim)
    assert mask_sub.shape == mask_ref.shape

    # bf16 MXU path vs f32 reference: check max error relative to output scale.
    rel_err = jnp.max(jnp.abs(y - y_ref)) / (jnp.max(jnp.abs(y_ref)) + 1e-6)
    assert rel_err < 2e-2, f"relative error too large: {rel_err}"
    assert jnp.allclose(pos_emb, pos_ref, atol=1e-6)
    assert jnp.array_equal(mask_sub, mask_ref)
    print("KERNEL_OK")
</pallas_src>

<mosaic_0001>
module attributes {stable_mosaic.version = 11 : i64} {
  func.func @kernel(%arg0: i32, %arg1: i32, %arg2: memref<1x1x128x26xbf16, #tpu.memory_space<vmem>>, %arg3: memref<26x128xbf16, #tpu.memory_space<vmem>>, %arg4: memref<8x128x128xbf16, #tpu.memory_space<vmem>>, %arg5: memref<16x128xf32, #tpu.memory_space<vmem>>, %arg6: memref<1x16x128xf32, #tpu.memory_space<vmem>>) attributes {dimension_semantics = [#tpu.dimension_semantics<parallel>, #tpu.dimension_semantics<parallel>], iteration_bounds = array<i64: 2, 1>, scalar_prefetch = 0 : i64, scratch_operands = 0 : i64, tpu.core_type = #tpu.core_type<tc>, window_params = [{transform_indices = @transform_0, window_bounds = array<i64: 1, 1, 128, 26>}, {pipeline_mode = #tpu.pipeline_mode<synchronous>, transform_indices = @transform_1, window_bounds = array<i64: 26, 128>}, {pipeline_mode = #tpu.pipeline_mode<synchronous>, transform_indices = @transform_2, window_bounds = array<i64: 8, 128, 128>}, {transform_indices = @transform_3, window_bounds = array<i64: 16, 128>}, {transform_indices = @transform_4, window_bounds = array<i64: 1, 16, 128>}]} {
    %c0 = arith.constant 0 : index
    %c0_0 = arith.constant 0 : index
    %c0_1 = arith.constant 0 : index
    %c0_2 = arith.constant 0 : index
    %0 = vector.load %arg2[%c0, %c0_0, %c0_1, %c0_2] : memref<1x1x128x26xbf16, #tpu.memory_space<vmem>>, vector<1x1x128x26xbf16>
    %1 = vector.shape_cast %0 : vector<1x1x128x26xbf16> to vector<128x26xbf16>
    %c0_3 = arith.constant 0 : index
    %c0_4 = arith.constant 0 : index
    %2 = vector.load %arg3[%c0_3, %c0_4] : memref<26x128xbf16, #tpu.memory_space<vmem>>, vector<26x128xbf16>
    %cst = arith.constant dense<0.000000e+00> : vector<128x128xf32>
    %3 = tpu.matmul %1, %2, %cst {dimension_numbers = #tpu.dot_dimension_numbers<[1], [0], [0], [1], [0, 0, 1, 1], [], []>} : vector<128x26xbf16>, vector<26x128xbf16>, vector<128x128xf32> -> vector<128x128xf32>
    %cst_5 = arith.constant 0.000000e+00 : f32
    %4 = vector.broadcast %cst_5 : f32 to vector<128x128xf32>
    %5 = arith.maximumf %3, %4 : vector<128x128xf32>
    %6 = arith.truncf %5 : vector<128x128xf32> to vector<128x128xbf16>
    %c0_6 = arith.constant 0 : index
    %c0_7 = arith.constant 0 : index
    %7 = vector.load %arg5[%c0_6, %c0_7] : memref<16x128xf32, #tpu.memory_space<vmem>>, vector<16x128xf32>
    %8 = vector.extract_strided_slice %6 {offsets = [0, 0], sizes = [16, 128], strides = [1, 1]} : vector<128x128xbf16> to vector<16x128xbf16>
    %c0_8 = arith.constant 0 : index
    %c0_9 = arith.constant 0 : index
    %c0_10 = arith.constant 0 : index
    %9 = vector.load %arg4[%c0_8, %c0_9, %c0_10] : memref<8x128x128xbf16, #tpu.memory_space<vmem>>, vector<1x128x128xbf16>
    %10 = vector.shape_cast %9 : vector<1x128x128xbf16> to vector<128x128xbf16>
    %cst_11 = arith.constant dense<0.000000e+00> : vector<16x128xf32>
    %11 = tpu.matmul %8, %10, %cst_11 {dimension_numbers = #tpu.dot_dimension_numbers<[1], [0], [0], [1], [0, 0, 1, 1], [], []>} : vector<16x128xbf16>, vector<128x128xbf16>, vector<16x128xf32> -> vector<16x128xf32>
    %12 = arith.addf %7, %11 : vector<16x128xf32>
    %13 = vector.extract_strided_slice %6 {offsets = [16, 0], sizes = [16, 128], strides = [1, 1]} : vector<128x128xbf16> to vector<16x128xbf16>
    %c1 = arith.constant 1 : index
    %c0_12 = arith.constant 0 : index
    %c0_13 = arith.constant 0 : index
    %14 = vector.load %arg4[%c1, %c0_12, %c0_13] : memref<8x128x128xbf16, #tpu.memory_space<vmem>>, vector<1x128x128xbf16>
    %15 = vector.shape_cast %14 : vector<1x128x128xbf16> to vector<128x128xbf16>
    %cst_14 = arith.constant dense<0.000000e+00> : vector<16x128xf32>
    %16 = tpu.matmul %13, %15, %cst_14 {dimension_numbers = #tpu.dot_dimension_numbers<[1], [0], [0], [1], [0, 0, 1, 1], [], []>} : vector<16x128xbf16>, vector<128x128xbf16>, vector<16x128xf32> -> vector<16x128xf32>
    %17 = arith.addf %12, %16 : vector<16x128xf32>
    %18 = vector.extract_strided_slice %6 {offsets = [32, 0], sizes = [16, 128], strides = [1, 1]} : vector<128x128xbf16> to vector<16x128xbf16>
    %c2 = arith.constant 2 : index
    %c0_15 = arith.constant 0 : index
    %c0_16 = arith.constant 0 : index
    %19 = vector.load %arg4[%c2, %c0_15, %c0_16] : memref<8x128x128xbf16, #tpu.memory_space<vmem>>, vector<1x128x128xbf16>
    %20 = vector.shape_cast %19 : vector<1x128x128xbf16> to vector<128x128xbf16>
    %cst_17 = arith.constant dense<0.000000e+00> : vector<16x128xf32>
    %21 = tpu.matmul %18, %20, %cst_17 {dimension_numbers = #tpu.dot_dimension_numbers<[1], [0], [0], [1], [0, 0, 1, 1], [], []>} : vector<16x128xbf16>, vector<128x128xbf16>, vector<16x128xf32> -> vector<16x128xf32>
    %22 = arith.addf %17, %21 : vector<16x128xf32>
    %23 = vector.extract_strided_slice %6 {offsets = [48, 0], sizes = [16, 128], strides = [1, 1]} : vector<128x128xbf16> to vector<16x128xbf16>
    %c3 = arith.constant 3 : index
    %c0_18 = arith.constant 0 : index
    %c0_19 = arith.constant 0 : index
    %24 = vector.load %arg4[%c3, %c0_18, %c0_19] : memref<8x128x128xbf16, #tpu.memory_space<vmem>>, vector<1x128x128xbf16>
    %25 = vector.shape_cast %24 : vector<1x128x128xbf16> to vector<128x128xbf16>
    %cst_20 = arith.constant dense<0.000000e+00> : vector<16x128xf32>
    %26 = tpu.matmul %23, %25, %cst_20 {dimension_numbers = #tpu.dot_dimension_numbers<[1], [0], [0], [1], [0, 0, 1, 1], [], []>} : vector<16x128xbf16>, vector<128x128xbf16>, vector<16x128xf32> -> vector<16x128xf32>
    %27 = arith.addf %22, %26 : vector<16x128xf32>
    %28 = vector.extract_strided_slice %6 {offsets = [64, 0], sizes = [16, 128], strides = [1, 1]} : vector<128x128xbf16> to vector<16x128xbf16>
    %c4 = arith.constant 4 : index
    %c0_21 = arith.constant 0 : index
    %c0_22 = arith.constant 0 : index
    %29 = vector.load %arg4[%c4, %c0_21, %c0_22] : memref<8x128x128xbf16, #tpu.memory_space<vmem>>, vector<1x128x128xbf16>
    %30 = vector.shape_cast %29 : vector<1x128x128xbf16> to vector<128x128xbf16>
    %cst_23 = arith.constant dense<0.000000e+00> : vector<16x128xf32>
    %31 = tpu.matmul %28, %30, %cst_23 {dimension_numbers = #tpu.dot_dimension_numbers<[1], [0], [0], [1], [0, 0, 1, 1], [], []>} : vector<16x128xbf16>, vector<128x128xbf16>, vector<16x128xf32> -> vector<16x128xf32>
    %32 = arith.addf %27, %31 : vector<16x128xf32>
    %33 = vector.extract_strided_slice %6 {offsets = [80, 0], sizes = [16, 128], strides = [1, 1]} : vector<128x128xbf16> to vector<16x128xbf16>
    %c5 = arith.constant 5 : index
    %c0_24 = arith.constant 0 : index
    %c0_25 = arith.constant 0 : index
    %34 = vector.load %arg4[%c5, %c0_24, %c0_25] : memref<8x128x128xbf16, #tpu.memory_space<vmem>>, vector<1x128x128xbf16>
    %35 = vector.shape_cast %34 : vector<1x128x128xbf16> to vector<128x128xbf16>
    %cst_26 = arith.constant dense<0.000000e+00> : vector<16x128xf32>
    %36 = tpu.matmul %33, %35, %cst_26 {dimension_numbers = #tpu.dot_dimension_numbers<[1], [0], [0], [1], [0, 0, 1, 1], [], []>} : vector<16x128xbf16>, vector<128x128xbf16>, vector<16x128xf32> -> vector<16x128xf32>
    %37 = arith.addf %32, %36 : vector<16x128xf32>
    %38 = vector.extract_strided_slice %6 {offsets = [96, 0], sizes = [16, 128], strides = [1, 1]} : vector<128x128xbf16> to vector<16x128xbf16>
    %c6 = arith.constant 6 : index
    %c0_27 = arith.constant 0 : index
    %c0_28 = arith.constant 0 : index
    %39 = vector.load %arg4[%c6, %c0_27, %c0_28] : memref<8x128x128xbf16, #tpu.memory_space<vmem>>, vector<1x128x128xbf16>
    %40 = vector.shape_cast %39 : vector<1x128x128xbf16> to vector<128x128xbf16>
    %cst_29 = arith.constant dense<0.000000e+00> : vector<16x128xf32>
    %41 = tpu.matmul %38, %40, %cst_29 {dimension_numbers = #tpu.dot_dimension_numbers<[1], [0], [0], [1], [0, 0, 1, 1], [], []>} : vector<16x128xbf16>, vector<128x128xbf16>, vector<16x128xf32> -> vector<16x128xf32>
    %42 = arith.addf %37, %41 : vector<16x128xf32>
    %43 = vector.extract_strided_slice %6 {offsets = [112, 0], sizes = [16, 128], strides = [1, 1]} : vector<128x128xbf16> to vector<16x128xbf16>
    %c7 = arith.constant 7 : index
    %c0_30 = arith.constant 0 : index
    %c0_31 = arith.constant 0 : index
    %44 = vector.load %arg4[%c7, %c0_30, %c0_31] : memref<8x128x128xbf16, #tpu.memory_space<vmem>>, vector<1x128x128xbf16>
    %45 = vector.shape_cast %44 : vector<1x128x128xbf16> to vector<128x128xbf16>
    %cst_32 = arith.constant dense<0.000000e+00> : vector<16x128xf32>
    %46 = tpu.matmul %43, %45, %cst_32 {dimension_numbers = #tpu.dot_dimension_numbers<[1], [0], [0], [1], [0, 0, 1, 1], [], []>} : vector<16x128xbf16>, vector<128x128xbf16>, vector<16x128xf32> -> vector<16x128xf32>
    %47 = arith.addf %42, %46 : vector<16x128xf32>
    %c0_33 = arith.constant 0 : index
    %c0_34 = arith.constant 0 : index
    %c0_35 = arith.constant 0 : index
    %48 = vector.load %arg6[%c0_33, %c0_34, %c0_35] : memref<1x16x128xf32, #tpu.memory_space<vmem>>, vector<1x16x128xf32>
    %49 = vector.shape_cast %48 : vector<1x16x128xf32> to vector<16x128xf32>
    %50 = vector.shape_cast %47 : vector<16x128xf32> to vector<1x16x128xf32>
    tpu.vector_store %arg6[%c0_33, %c0_34, %c0_35], %50 {strides = array<i32>} : memref<1x16x128xf32, #tpu.memory_space<vmem>>, vector<1x16x128xf32>,
    return
  }
  func.func @transform_0(%arg0: i32, %arg1: i32) -> (i32, i32, i32, i32) {
    %c0_i32 = arith.constant 0 : i32
    %c0_i32_0 = arith.constant 0 : i32
    %c0_i32_1 = arith.constant 0 : i32
    return %arg0, %arg1, %c0_i32, %c0_i32_0 : i32, i32, i32, i32
  }
  func.func @transform_1(%arg0: i32, %arg1: i32) -> (i32, i32) {
    %c0_i32 = arith.constant 0 : i32
    %c0_i32_0 = arith.constant 0 : i32
    %c0_i32_1 = arith.constant 0 : i32
    return %c0_i32, %c0_i32_0 : i32, i32
  }
  func.func @transform_2(%arg0: i32, %arg1: i32) -> (i32, i32, i32) {
    %c0_i32 = arith.constant 0 : i32
    %c0_i32_0 = arith.constant 0 : i32
    %c0_i32_1 = arith.constant 0 : i32
    %c0_i32_2 = arith.constant 0 : i32
    return %c0_i32, %c0_i32_0, %c0_i32_1 : i32, i32, i32
  }
  func.func @transform_3(%arg0: i32, %arg1: i32) -> (i32, i32) {
    %c0_i32 = arith.constant 0 : i32
    %c0_i32_0 = arith.constant 0 : i32
    return %arg1, %c0_i32 : i32, i32
  }
  func.func @transform_4(%arg0: i32, %arg1: i32) -> (i32, i32, i32) {
    %c0_i32 = arith.constant 0 : i32
    %c0_i32_0 = arith.constant 0 : i32
    return %arg0, %arg1, %c0_i32 : i32, i32, i32
  }
}

</mosaic_0001>

<bundles_post_ra>
// kernel: tpu_custom_call.1
= control target key start
LH: loop header
LB: loop body
LE: loop exit
PB: predicated region body
PF: predicated region fallthrough
CT: control target
= control target key end

     0   :  { %9 = vsyncpa [#allocation3], 0  ;;  %s2371_s0 = inlined_call_operand.vmem [shape: bf16[2,1,128,26], index: 0, kind: input, shape index: {}]   ;;  %s2372_s1 = inlined_call_operand.vmem [shape: bf16[26,128], index: 1, kind: input, shape index: {}]   ;;  %s2373_s2 = inlined_call_operand.hbm [shape: bf16[8,128,128], index: 2, kind: input, shape index: {}]   ;;  %s2374_s3 = inlined_call_operand.vmem [shape: f32[16,128], index: 3, kind: input, shape index: {}]   ;;  %s2375_s4 = inlined_call_operand.hbm [shape: f32[2,16,128], index: 4, kind: output, shape index: {}]  }
   0x1   :  { %10 = vsyncpa [#allocation4], 0 }
   0x2   :  { %12 = vsyncpa [#allocation4 + $0x1], 0  ;;  %s2126_s15 = smov 0   ;;  %s2128_s16 = smov 0  }
   0x3   :  { %s2130_s17 = smov 0   ;;  %s2132_s18 = smov 0  }
   0x4   :  { %s2134_s19 = smov 0   ;;  %s2136_s20 = smov 0  }
   0x5 LB: > { %s1476_s21 = sadd.s32 4294967295, %s2091_s20   ;;  %s1477_s22 = sadd.s32 4294967294, %s2091_s20   ;;  %s2091_s20 = sphi %s2136_s20, %s18_s20   ;;  %s2087_s19 = sphi %s2134_s19, %s2384_s19   ;;  %s2083_s18 = sphi %s2132_s18, %s2383_s18   ;;  %s2079_s17 = sphi %s2130_s17, %s2382_s17   ;;  %s2075_s16 = sphi %s2128_s16, %s2381_s16   ;;  %s2071_s15 = sphi %s2126_s15, %s2380_s15  }
   0x6   : > { %s30_s23 = sadd.s32 1, %s2087_s19  ;;  %s135_s24 = sadd.s32 1, %s2079_s17 }
   0x7   : > { %p32_p0 = scmp.ge.s32.totalorder %s30_s23, 2  ;;  %p145_p1 = scmp.ne.s32.totalorder %s2079_s17, %s2075_s16 }
   0x8   : > { %p146_p2 = scmp.eq.s32.totalorder %s1476_s21, 1  ;;  %p151_p3 = scmp.ne.s32.totalorder %s2075_s16, %s2071_s15 }
   0x9   : > { %s2386_s23 = smov (%p32_p0, %s30_s23), 0  ;;  %p152_p5 = scmp.eq.s32.totalorder %s1477_s22, 1 }
   0xa   : > { %p2166_p4 = por %p146_p2, %p145_p1  ;;  %s130_s26 = ssub.s32 %s2087_s19, %s2386_s23 }
   0xb   : > { %p1478_p6 = scmp.ge.s32.totalorder %s2091_s20, 1  ;;  %p133_p7 = scmp.eq.s32.totalorder %s130_s26, 0 }
   0xc   : > { %p2173_p8 = por %p152_p5, %p151_p3  ;;  %p159_p9 = scmp.lt.s32.totalorder %s2091_s20, 3 }
   0xd   : > { %s2179_s28 = scalar_select %p133_p7, %s2079_s17, %s135_s24  }
   0xe   : > { %p2181_p10 = pnand %p1478_p6, %p159_p9  ;;  %p2185_p11 = scmp.eq.s32.totalorder %s1476_s21, 0 }
   0xf   : > { %s2093_s5 = smov [#allocation2]  }
  0x10   : > { %p1845_p12 = pneg %p2181_p10  ;;  %s174_s6 = sshll.u32 %s2093_s5, 4  ;;  %s175_s6 = int_to_ptr.vmem [resolvable:$true] %s174_s6 }
  0x11   : > { %s1996_s7 = scalar_lea.vmem %s175_s6, 8192  ;;  %p2004_p5 = scmp.lt.s32.totalorder %s175_s6, %s175_s6 }
  0x12   : > { %p1846_p13 = pnand %p2185_p11, %p1845_p12  ;;  %p1997_p1 = scmp.ne.s32.totalorder %s175_s6, %s1996_s7 }
  0x13   : > { %p2005_p6 = scmp.lt.s32.totalorder %s1996_s7, %s1996_s7 }
  0x14   : > { %p1987_p0 = pneg %p1846_p13 }
  0x15   : > { %p2006_p7 = por %p2005_p6, %p2004_p5 }
  0x16   : > { %p1999_p2 = pnand %p1997_p1, %p1987_p0 }
  0x18   : > { %p2000_p3 = pneg %p1999_p2 }
  0x1a   : > { %p2007_p9 = pnand %p2006_p7, %p2000_p3 }
  0x1c   : > { %2010 = shalt.err (!%p2007_p9)
}
  0x1d   : > { %s2094_s8 = smov 64   ;;  %s2095_s9 = smov 4  }
  0x1e   : > { %1848 = dma.hbm_to_vmem [thread:$0]  (!%p1846_p13), %s2373_s2, 8192, %s175_s6, [#allocation3], %s2094_s8, %s2094_s8, %s2095_s9  }
  0x1f   : > { %211 = sbr.rel (%p2181_p10) target bundleno = 561 (0x231), region = 36 }
  0x24   : > { %2062 = dma.done.wait (%p2185_p11), [#allocation3], 8192  }
  0x25   : > { %2064 = vsyncadd (%p2185_p11), [#allocation3], 4294959104  ;;  %p246_p12 = scmp.lt.s32.totalorder %s2083_s18, 1  ;;  %v2096_v0 = vmov 0.0   ;;  %vm359_vm0 = vcmask 1044480   ;;  %v1912_v2 = vld [vmem:[%s2372_s1] sm:$0xff]  }
  0x26   : > { %1678 = vmatprep.subr.bf16.mxu1 %v2096_v0  ;;  %v1911_v1 = vld [vmem:[%s2372_s1 + $0x8] sm:$0x1f]   ;;  %vm334_vm1 = vcmask 211968   ;;  %v1921_v7 = vld [vmem:[#allocation2 + $0x78] sm:$0xff]   ;;  %v1923_v9 = vld [vmem:[#allocation2 + $0x70] sm:$0xff]   ;;  %vm2097_vm2 = vmmov 0  }
  0x27   : > { %s247_s12 = scalar_select %p246_p12, %s2083_s18, 1  ;;  %1838 = vmatprep.subr.msk.bf16.mxu0 %vm359_vm0, %v1911_v1  ;;  %v361_v3 = vsel %vm359_vm0, %v1911_v1, 0  ;;  %v1922_v8 = vld [vmem:[#allocation2 + $0x38] sm:$0xff]   ;;  %v1924_v10 = vld [vmem:[#allocation2 + $0x30] sm:$0xff]   ;;  %v1925_v13 = vld [vmem:[#allocation2 + $0x68] sm:$0xff]   ;;  %1694 = vmatprep.mubr.msk.bf16.mxu1 %vm2097_vm2, %v2096_v0 }
  0x28   : > { %1659 = vmatpush3.bf16.msra.mxu0 %v361_v3  ;;  %1679 = vmatpush3.bf16.msra.mxu1 %v1922_v8  ;;  %v1926_v14 = vld [vmem:[#allocation2 + $0x28] sm:$0xff]   ;;  %v1927_v16 = vld [vmem:[#allocation2 + $0x60] sm:$0xff]   ;;  %v1929_v19 = vld [vmem:[#allocation2 + $0x58] sm:$0xff]   ;;  %s243_s9 = sand.u32 1, %s2075_s16   ;;  %s2098_s26 = smov [#allocation5]  }
  0x29   : > { %s1574_s13 = sshll.u32 %s247_s12, 6  ;;  %1660 = vmatprep.subr.bf16.mxu0 %v1912_v2  ;;  %1680 = vmatprep.subr.bf16.mxu1 %v2096_v0  ;;  %v1928_v18 = vld [vmem:[#allocation2 + $0x20] sm:$0xff]   ;;  %v1930_v20 = vld [vmem:[#allocation2 + $0x18] sm:$0xff]   ;;  %v1931_v21 = vld [vmem:[#allocation2 + $0x50] sm:$0xff]   ;;  %s1484_s10 = sshll.u32 %s243_s9, 4 }
  0x2a   : > { %s2208_s22 = scalar_lea.vmem %s2371_s0, %s1574_s13  ;;  %v1932_v22 = vld [vmem:[#allocation2 + $0x10] sm:$0xff]   ;;  %v1933_v24 = vld [vmem:[#allocation2 + $0x48] sm:$0xff]   ;;  %v1935_v26 = vld [vmem:[#allocation2 + $0x40] sm:$0xff]   ;;  %s245_s11 = scalar_lea.vmem [#allocation5], %s1484_s10 }
  0x2b   : > { %v1913_v4 = vld [vmem:[%s2208_s22] sm:$0xff]   ;;  %v1914_v5 = vld [vmem:[%s2208_s22 + $0x8] sm:$0xff]   ;;  %v1915_v6 = vld [vmem:[%s2208_s22 + $0x10] sm:$0xff]   ;;  %s1367_s12 = sshll.u32 %s245_s11, 4  ;;  %s1575_s13 = sshll.u32 %s2083_s18, 8  ;;  %s2319_s12 = int_to_ptr.vmem [resolvable:$true] %s1367_s12 }
  0x2c   : > { %1662 = vmatprep.mubr.msk.bf16.mxu0 %vm334_vm1, %v1913_v4  ;;  %1661 = vmatpush3.bf16.msra.mxu0 %v1912_v2  ;;  %v1916_v11 = vld [vmem:[%s2208_s22 + $0x18] sm:$0xff]   ;;  %v1917_v12 = vld [vmem:[%s2208_s22 + $0x20] sm:$0xff]   ;;  %v1918_v15 = vld [vmem:[%s2208_s22 + $0x28] sm:$0xff]   ;;  %s2326_s24 = scalar_lea.sflag [#allocation4], %s243_s9  ;;  %s2011_s18 = scalar_lea.vmem %s2319_s12, 256 }
  0x2d   : > { %1698 = vmatprep.subr.bf16.mxu0 %v2096_v0  ;;  %1681 = vmatpush3.bf16.msra.mxu1 %v1924_v10  ;;  %v1919_v17 = vld [vmem:[%s2208_s22 + $0x30] sm:$0xff]   ;;  %v1920_v23 = vld [vmem:[%s2208_s22 + $0x38] sm:$0xff]   ;;  %v1934_v25 = vld [vmem:[#allocation2 + $0x8] sm:$0xff]   ;;  %s2324_s22 = scalar_lea.hbm %s2375_s4, %s1575_s13  ;;  %p2012_p10 = scmp.ne.s32.totalorder %s2319_s12, %s2011_s18 }
  0x2e   : > { %1682 = vmatprep.subr.bf16.mxu1 %v2096_v0  ;;  %v1936_v27 = vld [vmem:[#allocation2] sm:$0xff]   ;;  %v1937_v34 = vld [vmem:[#allocation2 + $0xf8] sm:$0xff]   ;;  %v1939_v40 = vld [vmem:[#allocation2 + $0xf0] sm:$0xff]   ;;  %s2015_s29 = sshll.u32 %s2098_s26, 4  ;;  %s2016_s29 = int_to_ptr.vmem [resolvable:$false] %s2015_s29 }
  0x2f   : > { %1663 = vmatmul.mubr.msk.bf16.vlgmr.msra.gmra.mxu0 %vm334_vm1, %v1914_v5  ;;  %v1938_v38 = vld [vmem:[#allocation2 + $0xb8] sm:$0xff]   ;;  %v1940_v41 = vld [vmem:[#allocation2 + $0xb0] sm:$0xff]   ;;  %v1941_v42 = vld [vmem:[#allocation2 + $0xe8] sm:$0xff]   ;;  %p2013_p11 = pnand %p2012_p10, %p2166_p4  ;;  %s2017_s30 = scalar_lea.vmem %s2016_s29, 512 }
  0x30   : > { %1666 = vmatprep.mubr.msk.bf16.mxu0 %vm334_vm1, %v1915_v6  ;;  %1699 = vmatpush3.bf16.msra.mxu0 %v1921_v7  ;;  %v1942_v43 = vld [vmem:[#allocation2 + $0xa8] sm:$0xff]   ;;  %v1943_v44 = vld [vmem:[#allocation2 + $0xe0] sm:$0xff]   ;;  %v1945_v46 = vld [vmem:[#allocation2 + $0xd8] sm:$0xff]   ;;  %p2018_p0 = scmp.lt.s32.totalorder %s2319_s12, %s2016_s29  ;;  %p2019_p1 = scmp.lt.s32.totalorder %s2017_s30, %s2011_s18 }
  0x31   : > { %1700 = vmatprep.subr.bf16.mxu0 %v2096_v0  ;;  %1683 = vmatpush3.bf16.msra.mxu1 %v1926_v14  ;;  %v1944_v45 = vld [vmem:[#allocation2 + $0xa0] sm:$0xff]   ;;  %v1946_v48 = vld [vmem:[#allocation2 + $0x98] sm:$0xff]   ;;  %v1947_v50 = vld [vmem:[#allocation2 + $0xd0] sm:$0xff]   ;;  %p2014_p13 = pneg %p2013_p11 }
  0x32   : > { %1684 = vmatprep.subr.bf16.mxu1 %v2096_v0  ;;  %v1948_v51 = vld [vmem:[#allocation2 + $0x90] sm:$0xff]   ;;  %v1949_v53 = vld [vmem:[#allocation2 + $0xc8] sm:$0xff]   ;;  %v1951_v56 = vld [vmem:[#allocation2 + $0xc0] sm:$0xff]   ;;  %p2020_p2 = por %p2019_p1, %p2018_p0 }
  0x33   : > { %v1950_v54 = vld [vmem:[#allocation2 + $0x88] sm:$0xff]   ;;  %v1952_v59 = vld [vmem:[#allocation2 + $0x80] sm:$0xff]   ;;  %v1953_v62 = vld [vmem:[#allocation2 + $0x178] sm:$0xff]  }
  0x34   : > { %1701 = vmatpush3.bf16.msra.mxu0 %v1923_v9  ;;  %v1954_v1 = vld [vmem:[#allocation2 + $0x138] sm:$0xff]   ;;  %v1955_v3 = vld [vmem:[#allocation2 + $0x170] sm:$0xff]   ;;  %v1957_v5 = vld [vmem:[#allocation2 + $0x168] sm:$0xff]   ;;  %p2021_p3 = pnand %p2020_p2, %p2014_p13 }
  0x35   : > { %1702 = vmatprep.subr.bf16.mxu0 %v2096_v0  ;;  %1685 = vmatpush3.bf16.msra.mxu1 %v1928_v18  ;;  %v1956_v4 = vld [vmem:[#allocation2 + $0x130] sm:$0xff]   ;;  %v1958_v6 = vld [vmem:[#allocation2 + $0x128] sm:$0xff]   ;;  %v1959_v7 = vld [vmem:[#allocation2 + $0x160] sm:$0xff]  }
  0x36   : > { %1686 = vmatprep.subr.bf16.mxu1 %v2096_v0  ;;  %v1960_v8 = vld [vmem:[#allocation2 + $0x120] sm:$0xff]   ;;  %v1961_v9 = vld [vmem:[#allocation2 + $0x158] sm:$0xff]   ;;  %v1964_v14 = vld [vmem:[#allocation2 + $0x110] sm:$0xff]  }
  0x37   : > { %1667 = vmatmul.mubr.msk.bf16.gmra.mxu0 %vm334_vm1, %v1916_v11  ;;  %v1962_v11 = vld [vmem:[#allocation2 + $0x118] sm:$0xff]  }
  0x38   : > { %1670 = vmatprep.mubr.msk.bf16.mxu0 %vm334_vm1, %v1917_v12  ;;  %1703 = vmatpush3.bf16.msra.mxu0 %v1925_v13  ;;  %v1963_v13 = vld [vmem:[#allocation2 + $0x150] sm:$0xff]  }
  0x39   : > { %1704 = vmatprep.subr.bf16.mxu0 %v2096_v0  ;;  %1687 = vmatpush3.bf16.msra.mxu1 %v1930_v20 }
  0x3a   : > { %1688 = vmatprep.subr.bf16.mxu1 %v2096_v0 }
  0x3c   : > { %1705 = vmatpush3.bf16.msra.mxu0 %v1927_v16  ;;  %v1965_v16 = vld [vmem:[#allocation2 + $0x148] sm:$0xff]  }
  0x3d   : > { %1706 = vmatprep.subr.bf16.mxu0 %v2096_v0  ;;  %1689 = vmatpush3.bf16.msra.mxu1 %v1932_v22  ;;  %v1968_v22 = vld [vmem:[#allocation2 + $0x100] sm:$0xff]  }
  0x3e   : > { %1690 = vmatprep.subr.bf16.mxu1 %v2096_v0 }
  0x3f   : > { %1671 = vmatmul.mubr.msk.bf16.gmra.mxu0 %vm334_vm1, %v1918_v15 }
  0x40   : > { %1674 = vmatprep.mubr.msk.bf16.mxu0 %vm334_vm1, %v1919_v17  ;;  %1707 = vmatpush3.bf16.msra.mxu0 %v1929_v19  ;;  %v1966_v17 = vld [vmem:[#allocation2 + $0x108] sm:$0xff]   ;;  %v1967_v19 = vld [vmem:[#allocation2 + $0x140] sm:$0xff]  }
  0x41   : > { %1708 = vmatprep.subr.bf16.mxu0 %v2096_v0  ;;  %1691 = vmatpush3.bf16.msra.mxu1 %v1934_v25  ;;  %v1969_v25 = vld [vmem:[#allocation2 + $0x1f8] sm:$0xff]  }
  0x42   : > { %1692 = vmatprep.subr.bf16.mxu1 %v2096_v0 }
  0x44   : > { %1709 = vmatpush3.bf16.msra.mxu0 %v1931_v21 }
  0x45   : > { %1710 = vmatprep.subr.bf16.mxu0 %v2096_v0  ;;  %1693 = vmatpush3.bf16.msra.mxu1 %v1936_v27  ;;  %v1970_v27 = vld [vmem:[#allocation2 + $0x1b8] sm:$0xff]  }
  0x46   : > { %1718 = vmatprep.subr.bf16.mxu1 %v2096_v0 }
  0x47   : > { %1675 = vmatmul.mubr.msk.bf16.gmra.mxu0 %vm334_vm1, %v1920_v23 }
  0x48   : > { %1711 = vmatpush3.bf16.msra.mxu0 %v1933_v24  ;;  %1714 = vmatprep.mubr.msk.bf16.mxu0 %vm2097_vm2, %v2096_v0 }
  0x49   : > { %1712 = vmatprep.subr.bf16.mxu0 %v2096_v0 }
  0x4c   : > { %1713 = vmatpush3.bf16.msra.mxu0 %v1935_v26 }
  0x4d   : > { %1738 = vmatprep.subr.bf16.mxu0 %v2096_v0 }
  0xef   : > { %v1664_v28 = vpop.f32.mrf.mxu0 }
  0xf0   : > { %v462_v31 = vmax.f32 %v1664_v28, 0.0 }
  0xf1   : > { %v397_v29 = vpop.f32.mrf.mxu0 }
  0xf2   : > { %v460_v35 = vmax.f32 %v397_v29, 0.0  ;;  %v1971_v29 = vld [vmem:[#allocation2 + $0x1f0] sm:$0xff]  }
  0xf3   : > { %v1665_v30 = vpop.f32.mrf.mxu0 }
  0xf4   : > { %v463_v32 = vmax.f32 %v1665_v30, 0.0  ;;  %v1972_v30 = vld [vmem:[#allocation2 + $0x1b0] sm:$0xff]  }
  0xf5   : > { %v400_v33 = vpop.f32.mrf.mxu0 }
  0xf6   : > { %v477_v36 = vpack.c.bf16 %v463_v32, %v462_v31  ;;  %v461_v37 = vmax.f32 %v400_v33, 0.0  ;;  %v1973_v31 = vld [vmem:[#allocation2 + $0x1e8] sm:$0xff]   ;;  %v1975_v33 = vld [vmem:[#allocation2 + $0x1e0] sm:$0xff]  }
  0xf7   : > { %v1668_v47 = vpop.f32.mrf.mxu0  ;;  %v1974_v32 = vld [vmem:[#allocation2 + $0x1a8] sm:$0xff]  }
  0xf8   : > { %v476_v39 = vpack.c.bf16 %v461_v37, %v460_v35  ;;  %1715 = vmatmul.mubr.bf16.vlgmr.msra.gmra.mxu0 %v477_v36  ;;  %v466_v57 = vmax.f32 %v1668_v47, 0.0  ;;  %v1977_v36 = vld [vmem:[#allocation2 + $0x1d8] sm:$0xff]  }
  0xf9   : > { %1739 = vmatpush3.bf16.msra.mxu0 %v1937_v34  ;;  %1754 = vmatprep.mubr.msk.bf16.mxu0 %vm2097_vm2, %v2096_v0  ;;  %v413_v49 = vpop.f32.mrf.mxu0  ;;  %v1976_v34 = vld [vmem:[#allocation2 + $0x1a0] sm:$0xff]   ;;  %v1978_v37 = vld [vmem:[#allocation2 + $0x198] sm:$0xff]  }
  0xfa   : > { %1695 = vmatmul.mubr.bf16.vlgmr.msra.gmra.mxu1 %v476_v39  ;;  %1740 = vmatprep.subr.bf16.mxu0 %v2096_v0  ;;  %v464_v60 = vmax.f32 %v413_v49, 0.0  ;;  %v1979_v39 = vld [vmem:[#allocation2 + $0x1d0] sm:$0xff]  }
  0xfb   : > { %1719 = vmatpush3.bf16.msra.mxu1 %v1938_v38  ;;  %1734 = vmatprep.mubr.msk.bf16.mxu1 %vm2097_vm2, %v2096_v0  ;;  %v1669_v52 = vpop.f32.mrf.mxu0 }
  0xfc   : > { %1720 = vmatprep.subr.bf16.mxu1 %v2096_v0  ;;  %v467_v58 = vmax.f32 %v1669_v52, 0.0 }
  0xfd   : > { %1741 = vmatpush3.bf16.msra.mxu0 %v1939_v40  ;;  %v416_v55 = vpop.f32.mrf.mxu0  ;;  %v1980_v40 = vld [vmem:[#allocation2 + $0x190] sm:$0xff]  }
  0xfe   : > { %1742 = vmatprep.subr.bf16.mxu0 %v2096_v0  ;;  %v465_v61 = vmax.f32 %v416_v55, 0.0  ;;  %v479_v63 = vpack.c.bf16 %v467_v58, %v466_v57 }
  0xff   : > { %1721 = vmatpush3.bf16.msra.mxu1 %v1940_v41  ;;  %v1672_v10 = vpop.f32.mrf.mxu0 }
 0x100   : > { %1722 = vmatprep.subr.bf16.mxu1 %v2096_v0  ;;  %v478_v2 = vpack.c.bf16 %v465_v61, %v464_v60  ;;  %v470_v20 = vmax.f32 %v1672_v10, 0.0 }
 0x101   : > { %1743 = vmatpush3.bf16.msra.mxu0 %v1941_v42  ;;  %v429_v12 = vpop.f32.mrf.mxu0  ;;  %v1981_v42 = vld [vmem:[#allocation2 + $0x1c8] sm:$0xff]  }
 0x102   : > { %1744 = vmatprep.subr.bf16.mxu0 %v2096_v0  ;;  %v468_v23 = vmax.f32 %v429_v12, 0.0 }
 0x103   : > { %1723 = vmatpush3.bf16.msra.mxu1 %v1942_v43  ;;  %v1673_v15 = vpop.f32.mrf.mxu0  ;;  %v1982_v43 = vld [vmem:[#allocation2 + $0x188] sm:$0xff]  }
 0x104   : > { %1724 = vmatprep.subr.bf16.mxu1 %v2096_v0  ;;  %v471_v21 = vmax.f32 %v1673_v15, 0.0 }
 0x105   : > { %1745 = vmatpush3.bf16.msra.mxu0 %v1943_v44  ;;  %v432_v18 = vpop.f32.mrf.mxu0 }
 0x106   : > { %1746 = vmatprep.subr.bf16.mxu0 %v2096_v0  ;;  %v469_v24 = vmax.f32 %v432_v18, 0.0  ;;  %v481_v26 = vpack.c.bf16 %v471_v21, %v470_v20 }
 0x107   : > { %1725 = vmatpush3.bf16.msra.mxu1 %v1944_v45  ;;  %v1676_v35 = vpop.f32.mrf.mxu0  ;;  %v1983_v45 = vld [vmem:[#allocation2 + $0x1c0] sm:$0xff]  }
 0x108   : > { %1726 = vmatprep.subr.bf16.mxu1 %v2096_v0  ;;  %v480_v28 = vpack.c.bf16 %v469_v24, %v468_v23 }
 0x109   : > { %1747 = vmatpush3.bf16.msra.mxu0 %v1945_v46  ;;  %v445_v38 = vpop.f32.mrf.mxu0  ;;  %v474_v46 = vmax.f32 %v1676_v35, 0.0 }
 0x10a   : > { %1748 = vmatprep.subr.bf16.mxu0 %v2096_v0  ;;  %v472_v49 = vmax.f32 %v445_v38, 0.0 }
 0x10b   : > { %1727 = vmatpush3.bf16.msra.mxu1 %v1946_v48  ;;  %v1677_v41 = vpop.f32.mrf.mxu0  ;;  %v1984_v48 = vld [vmem:[#allocation2 + $0x180] sm:$0xff]  }
 0x10c   : > { %1728 = vmatprep.subr.bf16.mxu1 %v2096_v0  ;;  %v475_v47 = vmax.f32 %v1677_v41, 0.0 }
 0x10d   : > { %1749 = vmatpush3.bf16.msra.mxu0 %v1947_v50  ;;  %v448_v44 = vpop.f32.mrf.mxu0 }
 0x10e   : > { %1750 = vmatprep.subr.bf16.mxu0 %v2096_v0  ;;  %v473_v50 = vmax.f32 %v448_v44, 0.0 }
 0x10f   : > { %1729 = vmatpush3.bf16.msra.mxu1 %v1948_v51  ;;  %v483_v51 = vpack.c.bf16 %v475_v47, %v474_v46 }
 0x110   : > { %1730 = vmatprep.subr.bf16.mxu1 %v2096_v0  ;;  %v482_v52 = vpack.c.bf16 %v473_v50, %v472_v49 }
 0x111   : > { %1751 = vmatpush3.bf16.msra.mxu0 %v1949_v53 }
 0x112   : > { %1752 = vmatprep.subr.bf16.mxu0 %v2096_v0 }
 0x113   : > { %1731 = vmatpush3.bf16.msra.mxu1 %v1950_v54  ;;  %v484_v54 = vld [vmem:[%s2374_s3] sm:$0xff] }
 0x114   : > { %1732 = vmatprep.subr.bf16.mxu1 %v2096_v0 }
 0x115   : > { %1753 = vmatpush3.bf16.msra.mxu0 %v1951_v56 }
 0x116   : > { %1778 = vmatprep.subr.bf16.mxu0 %v2096_v0 }
 0x117   : > { %1733 = vmatpush3.bf16.msra.mxu1 %v1952_v59 }
 0x118   : > { %1755 = vmatmul.mubr.bf16.vlgmr.msra.gmra.mxu0 %v479_v63  ;;  %1758 = vmatprep.subr.bf16.mxu1 %v2096_v0 }
 0x119   : > { %1779 = vmatpush3.bf16.msra.mxu0 %v1953_v62  ;;  %1794 = vmatprep.mubr.msk.bf16.mxu0 %vm2097_vm2, %v2096_v0 }
 0x11a   : > { %1735 = vmatmul.mubr.bf16.vlgmr.msra.gmra.mxu1 %v478_v2  ;;  %1780 = vmatprep.subr.bf16.mxu0 %v2096_v0 }
 0x11b   : > { %1759 = vmatpush3.bf16.msra.mxu1 %v1954_v1  ;;  %1774 = vmatprep.mubr.msk.bf16.mxu1 %vm2097_vm2, %v2096_v0 }
 0x11c   : > { %1760 = vmatprep.subr.bf16.mxu1 %v2096_v0 }
 0x11d   : > { %1781 = vmatpush3.bf16.msra.mxu0 %v1955_v3 }
 0x11e   : > { %1782 = vmatprep.subr.bf16.mxu0 %v2096_v0 }
 0x11f   : > { %1761 = vmatpush3.bf16.msra.mxu1 %v1956_v4 }
 0x120   : > { %1762 = vmatprep.subr.bf16.mxu1 %v2096_v0 }
 0x121   : > { %1783 = vmatpush3.bf16.msra.mxu0 %v1957_v5 }
 0x122   : > { %1784 = vmatprep.subr.bf16.mxu0 %v2096_v0 }
 0x123   : > { %1763 = vmatpush3.bf16.msra.mxu1 %v1958_v6 }
 0x124   : > { %1764 = vmatprep.subr.bf16.mxu1 %v2096_v0 }
 0x125   : > { %1785 = vmatpush3.bf16.msra.mxu0 %v1959_v7 }
 0x126   : > { %1786 = vmatprep.subr.bf16.mxu0 %v2096_v0 }
 0x127   : > { %1765 = vmatpush3.bf16.msra.mxu1 %v1960_v8 }
 0x128   : > { %1766 = vmatprep.subr.bf16.mxu1 %v2096_v0 }
 0x129   : > { %1787 = vmatpush3.bf16.msra.mxu0 %v1961_v9 }
 0x12a   : > { %1788 = vmatprep.subr.bf16.mxu0 %v2096_v0 }
 0x12b   : > { %1767 = vmatpush3.bf16.msra.mxu1 %v1962_v11 }
 0x12c   : > { %1768 = vmatprep.subr.bf16.mxu1 %v2096_v0 }
 0x12d   : > { %1789 = vmatpush3.bf16.msra.mxu0 %v1963_v13 }
 0x12e   : > { %1790 = vmatprep.subr.bf16.mxu0 %v2096_v0 }
 0x12f   : > { %1769 = vmatpush3.bf16.msra.mxu1 %v1964_v14 }
 0x130   : > { %1770 = vmatprep.subr.bf16.mxu1 %v2096_v0 }
 0x131   : > { %1791 = vmatpush3.bf16.msra.mxu0 %v1965_v16 }
 0x132   : > { %1792 = vmatprep.subr.bf16.mxu0 %v2096_v0 }
 0x133   : > { %1771 = vmatpush3.bf16.msra.mxu1 %v1966_v17 }
 0x134   : > { %1772 = vmatprep.subr.bf16.mxu1 %v2096_v0 }
 0x135   : > { %1793 = vmatpush3.bf16.msra.mxu0 %v1967_v19 }
 0x136   : > { %1818 = vmatprep.subr.bf16.mxu0 %v2096_v0 }
 0x137   : > { %1773 = vmatpush3.bf16.msra.mxu1 %v1968_v22 }
 0x138   : > { %1795 = vmatmul.mubr.bf16.vlgmr.msra.gmra.mxu0 %v481_v26  ;;  %1798 = vmatprep.subr.bf16.mxu1 %v2096_v0 }
 0x139   : > { %1819 = vmatpush3.bf16.msra.mxu0 %v1969_v25  ;;  %1834 = vmatprep.mubr.msk.bf16.mxu0 %vm2097_vm2, %v2096_v0 }
 0x13a   : > { %1775 = vmatmul.mubr.bf16.vlgmr.msra.gmra.mxu1 %v480_v28  ;;  %1820 = vmatprep.subr.bf16.mxu0 %v2096_v0 }
 0x13b   : > { %1799 = vmatpush3.bf16.msra.mxu1 %v1970_v27  ;;  %1814 = vmatprep.mubr.msk.bf16.mxu1 %vm2097_vm2, %v2096_v0 }
 0x13c   : > { %1800 = vmatprep.subr.bf16.mxu1 %v2096_v0 }
 0x13d   : > { %1821 = vmatpush3.bf16.msra.mxu0 %v1971_v29 }
 0x13e   : > { %1822 = vmatprep.subr.bf16.mxu0 %v2096_v0 }
 0x13f   : > { %1801 = vmatpush3.bf16.msra.mxu1 %v1972_v30 }
 0x140   : > { %1802 = vmatprep.subr.bf16.mxu1 %v2096_v0 }
 0x141   : > { %1823 = vmatpush3.bf16.msra.mxu0 %v1973_v31 }
 0x142   : > { %1824 = vmatprep.subr.bf16.mxu0 %v2096_v0 }
 0x143   : > { %1803 = vmatpush3.bf16.msra.mxu1 %v1974_v32 }
 0x144   : > { %1804 = vmatprep.subr.bf16.mxu1 %v2096_v0 }
 0x145   : > { %1825 = vmatpush3.bf16.msra.mxu0 %v1975_v33 }
 0x146   : > { %1826 = vmatprep.subr.bf16.mxu0 %v2096_v0 }
 0x147   : > { %1805 = vmatpush3.bf16.msra.mxu1 %v1976_v34 }
 0x148   : > { %1806 = vmatprep.subr.bf16.mxu1 %v2096_v0 }
 0x149   : > { %1827 = vmatpush3.bf16.msra.mxu0 %v1977_v36 }
 0x14a   : > { %1828 = vmatprep.subr.bf16.mxu0 %v2096_v0 }
 0x14b   : > { %1807 = vmatpush3.bf16.msra.mxu1 %v1978_v37 }
 0x14c   : > { %1808 = vmatprep.subr.bf16.mxu1 %v2096_v0 }
 0x14d   : > { %1829 = vmatpush3.bf16.msra.mxu0 %v1979_v39 }
 0x14e   : > { %1830 = vmatprep.subr.bf16.mxu0 %v2096_v0 }
 0x14f   : > { %1809 = vmatpush3.bf16.msra.mxu1 %v1980_v40 }
 0x150   : > { %1810 = vmatprep.subr.bf16.mxu1 %v2096_v0 }
 0x151   : > { %1831 = vmatpush3.bf16.msra.mxu0 %v1981_v42 }
 0x152   : > { %1832 = vmatprep.subr.bf16.mxu0 %v2096_v0 }
 0x153   : > { %1811 = vmatpush3.bf16.msra.mxu1 %v1982_v43 }
 0x154   : > { %1812 = vmatprep.subr.bf16.mxu1 %v2096_v0  ;;  %v485_v0 = vld [vmem:[%s2374_s3 + $0x8] sm:$0xff] }
 0x155   : > { %1833 = vmatpush3.bf16.msra.mxu0 %v1983_v45 }
 0x157   : > { %1813 = vmatpush3.bf16.msra.mxu1 %v1984_v48 }
 0x158   : > { %1835 = vmatmul.mubr.bf16.vlgmr.msra.gmra.mxu0 %v483_v51 }
 0x15a   : > { %1815 = vmatmul.mubr.bf16.vlgmr.msra.gmra.mxu1 %v482_v52 }
 0x1b8   : > { %v692_v53 = vpop.f32.mrf.mxu0 }
 0x1ba   : > { %v584_v55 = vpop.f32.mrf.mxu1  ;;  %v1716_v56 = vpop.f32.mrf.mxu0 }
 0x1bb   : > { %v591_v57 = vadd.f32 %v584_v55, %v484_v54 }
 0x1bc   : > { %v1696_v58 = vpop.f32.mrf.mxu1  ;;  %v695_v59 = vpop.f32.mrf.mxu0 }
 0x1bd   : > { %v699_v60 = vadd.f32 %v692_v53, %v591_v57 }
 0x1be   : > { %v587_v61 = vpop.f32.mrf.mxu1  ;;  %v1717_v62 = vpop.f32.mrf.mxu0 }
 0x1bf   : > { %v592_v63 = vadd.f32 %v587_v61, %v485_v0 }
 0x1c0   : > { %v1697_v1 = vpop.f32.mrf.mxu1 }
 0x1c1   : > { %v700_v2 = vadd.f32 %v695_v59, %v592_v63 }
 0x1d8   : > { %v908_v3 = vpop.f32.mrf.mxu0 }
 0x1da   : > { %v800_v4 = vpop.f32.mrf.mxu1  ;;  %v1756_v5 = vpop.f32.mrf.mxu0 }
 0x1db   : > { %v807_v19 = vadd.f32 %v800_v4, %v699_v60 }
 0x1dc   : > { %v1736_v6 = vpop.f32.mrf.mxu1  ;;  %v911_v7 = vpop.f32.mrf.mxu0 }
 0x1dd   : > { %v915_v21 = vadd.f32 %v908_v3, %v807_v19 }
 0x1de   : > { %v803_v8 = vpop.f32.mrf.mxu1  ;;  %v1757_v9 = vpop.f32.mrf.mxu0 }
 0x1df   : > { %v808_v20 = vadd.f32 %v803_v8, %v700_v2 }
 0x1e0   : > { %v1737_v10 = vpop.f32.mrf.mxu1 }
 0x1e1   : > { %v916_v23 = vadd.f32 %v911_v7, %v808_v20 }
 0x1f8   : > { %v1124_v11 = vpop.f32.mrf.mxu0 }
 0x1fa   : > { %v1016_v12 = vpop.f32.mrf.mxu1  ;;  %v1796_v13 = vpop.f32.mrf.mxu0 }
 0x1fb   : > { %v1023_v22 = vadd.f32 %v1016_v12, %v915_v21 }
 0x1fc   : > { %v1776_v14 = vpop.f32.mrf.mxu1  ;;  %v1127_v15 = vpop.f32.mrf.mxu0 }
 0x1fd   : > { %v1131_v26 = vadd.f32 %v1124_v11, %v1023_v22 }
 0x1fe   : > { %v1019_v16 = vpop.f32.mrf.mxu1  ;;  %v1797_v17 = vpop.f32.mrf.mxu0 }
 0x1ff   : > { %v1024_v25 = vadd.f32 %v1019_v16, %v916_v23 }
 0x200   : > { %v1777_v18 = vpop.f32.mrf.mxu1 }
 0x201   : > { %v1132_v33 = vadd.f32 %v1127_v15, %v1024_v25 }
 0x218   : > { %v1340_v24 = vpop.f32.mrf.mxu0 }
 0x21a   : > { %v1232_v27 = vpop.f32.mrf.mxu1  ;;  %v1836_v28 = vpop.f32.mrf.mxu0 }
 0x21b   : > { %v1239_v29 = vadd.f32 %v1232_v27, %v1131_v26 }
 0x21c   : > { %v1816_v30 = vpop.f32.mrf.mxu1  ;;  %v1343_v31 = vpop.f32.mrf.mxu0 }
 0x21d   : > { %v1347_v32 = vadd.f32 %v1340_v24, %v1239_v29 }
 0x21e   : > { %v1235_v34 = vpop.f32.mrf.mxu1  ;;  %v1837_v35 = vpop.f32.mrf.mxu0 }
 0x21f   : > { %1349 = vst [vmem:[%s245_s11] sm:$0xff] %v1347_v32  ;;  %v1240_v36 = vadd.f32 %v1235_v34, %v1132_v33 }
 0x220   : > { %v1817_v37 = vpop.f32.mrf.mxu1 }
 0x221   : > { %v1348_v38 = vadd.f32 %v1343_v31, %v1240_v36 }
 0x223   : > { %1350 = vst [vmem:[%s245_s11 + $0x8] sm:$0xff] %v1348_v38 }
 0x224   : > { %2024 = shalt.err (!%p2021_p3)
}
 0x225   : > { %s2025_s5 = scalar_lea.hbm %s2324_s22, 256  ;;  %s2029_s8 = scalar_lea.hbm %s2375_s4, 512 }
 0x226   : > { %p2026_p5 = scmp.ne.s32.totalorder %s2324_s22, %s2025_s5  ;;  %p2030_p9 = scmp.lt.s32.totalorder %s2324_s22, %s2375_s4 }
 0x227   : > { %p2031_p12 = scmp.lt.s32.totalorder %s2029_s8, %s2025_s5 }
 0x228   : > { %p2027_p6 = pnand %p2026_p5, %p2166_p4 }
 0x229   : > { %p2032_p10 = por %p2031_p12, %p2030_p9 }
 0x22a   : > { %p2028_p7 = pneg %p2027_p6 }
 0x22c   : > { %p2033_p11 = pnand %p2032_p10, %p2028_p7 }
 0x22e   : > { %2036 = shalt.err (!%p2033_p11)
}
 0x22f   : > { %s2099_s11 = smov 128   ;;  %s2100_s13 = smov 8  }
 0x230   : > { %1843 = dma.vmem_to_hbm [thread:$0]  (%p2166_p4), %s2319_s12, 256, %s2324_s22, %s2326_s24, %s2099_s11, %s2099_s11, %s2100_s13  }
 0x231 PF: > { %p1855_p13 = scmp.ge.s32.totalorder %s2091_s20, 2  ;;  %s1382_s14 = sand.u32 1, %s2071_s15  }
 0x232   : > { %s1383_s21 = scalar_lea.sflag [#allocation4], %s1382_s14 }
 0x233   : > { %p1850_p0 = pnand %p1855_p13, %p2173_p8 }
 0x235   : > { %p1851_p1 = pneg %p1850_p0 }
 0x237   : > { %2066 = dma.done.wait (%p1851_p1), %s1383_s21, 256  }
 0x238   : > { %2068 = vsyncadd (%p1851_p1), %s1383_s21, 4294967040  ;;  %s18_s20 = sadd.s32 1, %s2091_s20   ;;  %s2380_s15 = smov %s2075_s16 }
 0x239   : > { %p15_p2 = scmp.ge.s32.totalorder %s18_s20, 4   ;;  %s2381_s16 = smov %s2079_s17 }
 0x23a   : > { %s2382_s17 = smov %s2179_s28  ;;  %s2383_s18 = smov %s2087_s19 }
 0x23b   : > { %s2384_s19 = smov %s2386_s23  ;;  %17 = sbr.rel (!%p15_p2) target bundleno = 5 (0x5), region = 86 }
 0x240   :  { %1388 = vsyncpa [#allocation3], 1 }
 0x241   :  { %1390 = vsyncpa [#allocation3 + $0x1], 1 }
 0x242   :  { %1391 = vsyncpa [#allocation4], 1 }
 0x243   :  { %1393 = vsyncpa [#allocation4 + $0x1], 1 }

</bundles_post_ra>
